<compile_context>
chip_gen: v6e
topology: v6e:2x2x1
jax: 0.10.0
libtpu: 0.0.40
codegen_flags: <defaults>
</compile_context>

<pallas_src>
import jax
import jax.numpy as jnp
from jax.experimental import pallas as pl
from jax.experimental.pallas import tpu as pltpu

_LANES = 128


def _linear_scalar_kernel(w_ref, b_ref, x_ref, o_ref):
    # w_ref / b_ref: (1,) scalars in SMEM.  x_ref / o_ref: lane-dense VMEM tiles.
    w = w_ref[0]
    b = b_ref[0]
    xv = x_ref[...].astype(jnp.float32)          # upcast (no-op for f32 inputs)
    o_ref[...] = (xv * w + b).astype(o_ref.dtype)  # pure VPU multiply-add


def _round_up(v, m):
    return ((v + m - 1) // m) * m


def linear_a_forward(x, w, b, *, block_rows=1024):
    """y = x @ w + b for the degenerate in_dim = out_dim = 1 case.

    x: (N, 1), w: (1, 1), b: (1,)  ->  (N, 1)
    """
    n, in_dim = x.shape
    out_dim = w.shape[1]
    assert in_dim == 1 and out_dim == 1, "LinearModel always uses Linear_A(1, 1)"

    # --- lane-dense repacking: (N, 1) -> (rows_padded, 128) -------------------
    x_flat = x.reshape(-1)
    total = x_flat.shape[0]
    padded = max(_round_up(total, _LANES), _LANES)
    rows = padded // _LANES
    blk = min(block_rows, rows)                # shrink block for small inputs
    rows_padded = _round_up(rows, blk)
    padded = rows_padded * _LANES

    x_slab = jnp.zeros((padded,), dtype=x.dtype).at[:total].set(x_flat)
    x_slab = x_slab.reshape(rows_padded, _LANES)

    # scalar parameters -> SMEM
    w_s = w.reshape(1).astype(jnp.float32)
    b_s = b.reshape(1).astype(jnp.float32)

    grid = (rows_padded // blk,)
    itemsize = jnp.dtype(x.dtype).itemsize

    out_slab = pl.pallas_call(
        _linear_scalar_kernel,
        out_shape=jax.ShapeDtypeStruct((rows_padded, _LANES), x.dtype),
        grid=grid,
        in_specs=[
            pl.BlockSpec(memory_space=pltpu.MemorySpace.SMEM),   # w scalar
            pl.BlockSpec(memory_space=pltpu.MemorySpace.SMEM),   # b scalar
            pl.BlockSpec((blk, _LANES), lambda i: (i, 0)),       # x tile
        ],
        out_specs=pl.BlockSpec((blk, _LANES), lambda i: (i, 0)),
        compiler_params=pltpu.CompilerParams(
            dimension_semantics=("parallel",),
            vmem_limit_bytes=32 * 1024 * 1024,
        ),
        cost_estimate=pl.CostEstimate(
            flops=2 * padded,
            transcendentals=0,
            bytes_accessed=2 * padded * itemsize,
        ),
    )(w_s, b_s, x_slab)

    # undo the lane-dense reshape / padding
    return out_slab.reshape(-1)[:total].reshape(n, out_dim)


def linear_model_forward(x, params):
    # LinearModel.forward only calls the Linear_A sub-module.
    # TODO(synk): BatchNorm2d is declared in __init__ but never used in forward.
    return linear_a_forward(x, params["w"], params["b"])


def init_params(key, in_dim=1, out_dim=1):
    kw, kb = jax.random.split(key)
    # Deterministic stand-ins for torch.randn parameter init.
    w = jax.random.normal(kw, (in_dim, out_dim), dtype=jnp.float32)
    b = jax.random.normal(kb, (out_dim,), dtype=jnp.float32)
    return {"w": w, "b": b}


if __name__ == "__main__":
    key = jax.random.PRNGKey(0)
    k_param, k_x = jax.random.split(key)

    in_dim, out_dim = 1, 1
    n = 8  # small batch of rows (matches the module's (N, 1) input convention)

    params = init_params(k_param, in_dim, out_dim)
    x = jax.random.normal(k_x, (n, in_dim), dtype=jnp.float32)

    y = linear_model_forward(x, params)
    y = jax.block_until_ready(y)

    # Pure-JAX reference check.
    y_ref = x @ params["w"] + params["b"]
    assert y.shape == (n, out_dim)
    assert jnp.allclose(y, y_ref, atol=1e-5, rtol=1e-5)

    print("KERNEL_OK")
</pallas_src>

<mosaic_0001>
module attributes {stable_mosaic.version = 11 : i64} {
  func.func @_linear_scalar_kernel(%arg0: i32, %arg1: memref<1xf32, #tpu.memory_space<smem>>, %arg2: memref<1xf32, #tpu.memory_space<smem>>, %arg3: memref<1x128xf32, #tpu.memory_space<vmem>>, %arg4: memref<1x128xf32, #tpu.memory_space<vmem>>) attributes {dimension_semantics = [#tpu.dimension_semantics<parallel>], iteration_bounds = array<i64: 1>, scalar_prefetch = 0 : i64, scratch_operands = 0 : i64, tpu.core_type = #tpu.core_type<tc>, window_params = [{transform_indices = @transform_0, window_bounds = array<i64: 1>}, {transform_indices = @transform_1, window_bounds = array<i64: 1>}, {transform_indices = @transform_2, window_bounds = array<i64: 1, 128>}, {transform_indices = @transform_3, window_bounds = array<i64: 1, 128>}]} {
    %c0 = arith.constant 0 : index
    %0 = memref.load %arg1[%c0] : memref<1xf32, #tpu.memory_space<smem>>
    %c0_0 = arith.constant 0 : index
    %1 = memref.load %arg2[%c0_0] : memref<1xf32, #tpu.memory_space<smem>>
    %c0_1 = arith.constant 0 : index
    %c0_2 = arith.constant 0 : index
    %2 = vector.load %arg3[%c0_1, %c0_2] : memref<1x128xf32, #tpu.memory_space<vmem>>, vector<1x128xf32>
    %3 = vector.broadcast %0 : f32 to vector<1x128xf32>
    %4 = arith.mulf %2, %3 : vector<1x128xf32>
    %5 = vector.broadcast %1 : f32 to vector<1x128xf32>
    %6 = arith.addf %4, %5 : vector<1x128xf32>
    %c0_3 = arith.constant 0 : index
    %c0_4 = arith.constant 0 : index
    %7 = vector.load %arg4[%c0_3, %c0_4] : memref<1x128xf32, #tpu.memory_space<vmem>>, vector<1x128xf32>
    tpu.vector_store %arg4[%c0_3, %c0_4], %6 {strides = array<i32>} : memref<1x128xf32, #tpu.memory_space<vmem>>, vector<1x128xf32>,
    return
  }
  func.func @transform_0(%arg0: i32) -> i32 {
    %c0_i32 = arith.constant 0 : i32
    %c0_i32_0 = arith.constant 0 : i32
    return %c0_i32 : i32
  }
  func.func @transform_1(%arg0: i32) -> i32 {
    %c0_i32 = arith.constant 0 : i32
    %c0_i32_0 = arith.constant 0 : i32
    return %c0_i32 : i32
  }
  func.func @transform_2(%arg0: i32) -> (i32, i32) {
    %c0_i32 = arith.constant 0 : i32
    %c0_i32_0 = arith.constant 0 : i32
    return %arg0, %c0_i32 : i32, i32
  }
  func.func @transform_3(%arg0: i32) -> (i32, i32) {
    %c0_i32 = arith.constant 0 : i32
    %c0_i32_0 = arith.constant 0 : i32
    return %arg0, %c0_i32 : i32, i32
  }
}

</mosaic_0001>

<bundles_post_ra>
// kernel: tpu_custom_call.1
= control target key start
LH: loop header
LB: loop body
LE: loop exit
PB: predicated region body
PF: predicated region fallthrough
CT: control target
= control target key end

     0   :  { %s95_s0 = inlined_call_operand.<no memory space> [shape: f32[1], index: 0, kind: input, shape index: {}]   ;;  %s96_s1 = inlined_call_operand.<no memory space> [shape: f32[1], index: 1, kind: input, shape index: {}]   ;;  %s97_s2 = inlined_call_operand.vmem [shape: f32[1,128], index: 2, kind: input, shape index: {}]   ;;  %s98_s3 = inlined_call_operand.hbm [shape: f32[1,128], index: 3, kind: output, shape index: {}]  }
   0x1   :  { %v19_v0 = vld [vmem:[%s97_s2] sm:$0x1]  ;;  %v20_v1 = vstv %s95_s0  ;;  %v22_v2 = vstv %s96_s1 }
   0x2   :  { %10 = vsyncpa [#allocation5], 0  ;;  %v21_v3 = vmul.f32 %v20_v1, %v19_v0  ;;  %s62_s18 = smov [#allocation4]  }
   0x3   :  { %s31_s19 = sshll.u32 %s62_s18, 4  ;;  %s32_s19 = int_to_ptr.vmem [resolvable:$true] %s31_s19 }
   0x4   :  { %v23_v4 = vadd.f32 %v22_v2, %v21_v3  ;;  %s40_s20 = scalar_lea.vmem %s32_s19, 16  ;;  %s44_s21 = scalar_lea.vmem %s32_s19, 32 }
   0x5   :  { %p41_p0 = scmp.ne.s32.totalorder %s32_s19, %s40_s20  ;;  %p45_p1 = scmp.lt.s32.totalorder %s32_s19, %s32_s19 }
   0x6   :  { %24 = vst [vmem:[#allocation4] sm:$0x1] %v23_v4  ;;  %p46_p2 = scmp.lt.s32.totalorder %s44_s21, %s40_s20 }
   0x8   :  { %p47_p3 = por %p46_p2, %p45_p1 }
   0xa   :  { %p48_p4 = pnand %p47_p3, %p41_p0 }
   0xc   :  { %51 = shalt.err (!%p48_p4)
}
   0xd   :  { %34 = dma.vmem_to_hbm [thread:$0]  %s32_s19, 16, %s98_s3, [#allocation5]  }
   0xe   :  { %60 = dma.done.wait [#allocation5], 16  }
   0xf   :  { %61 = vsyncadd [#allocation5], 4294967280 }
  0x10   :  { %38 = vsyncpa [#allocation5], 1 }

</bundles_post_ra>
